<compile_context>
chip_gen: v7x
topology: tpu7x:2x2x1
jax: 0.10.0
libtpu: 0.0.40
codegen_flags: <defaults>
</compile_context>

<pallas_src>
import functools
import math

import jax
import jax.numpy as jnp
import numpy as np
from jax import lax
from jax.experimental import pallas as pl
from jax.experimental.pallas import tpu as pltpu


def _vmem_bytes_per_step(S, D, tq, attn_bytes):
    """Per-step VMEM footprint: double-buffered pipeline blocks + live (tq,S) temporaries."""
    blocks = 2 * (4 * tq * D              # q tile
                  + 2 * 4 * S * D         # K and V blocks
                  + 4 * (tq + S)          # rep-mask column / row views
                  + 4 * tq * D            # out tile
                  + attn_bytes * tq * S)  # attn tile (dominant output stream)
    temps = 7 * 4 * tq * S                # f32 scores / att / mask / exps / attn ...
    temps += 2 * 2 * tq * S               # bf16 copies fed to the MXU
    temps += 2 * 2 * S * D                # bf16 copies of K / V
    return blocks + temps


def _choose_tq(B, S, D, attn_bytes, budget_bytes=24 << 20):
    """Largest query tile (multiple of 8, divisor of S, <= 256) whose working set fits the
    budget; keeps at least 2 grid steps so both v7x TensorCores get work."""
    cands = [t for t in (256, 128, 64, 32, 16, 8) if t < S and S % t == 0]
    if S <= 256:
        cands = [S] + cands
    if not cands:
        cands = [S]                       # odd / indivisible S: one full-S tile
    if B * (S // cands[0]) < 2 and len(cands) > 1:
        cands = cands[1:]                 # avoid a degenerate single-step grid
    for t in cands:
        if _vmem_bytes_per_step(S, D, t, attn_bytes) <= budget_bytes:
            return t
    return cands[-1]


def masked_attention_kernel(q_ref, k_ref, v_ref, rm_col_ref, rm_row_ref,
                            out_ref, attn_ref, *,
                            inv_scale, alpha_signed, direction, tq, matmul_dtype):
    S = k_ref.shape[1]

    # Fold 1/sqrt(D) into q (TQ*D elements) instead of scaling TQ*S scores, then feed the
    # MXU in matmul_dtype (bf16 by default) with f32 accumulation.  Contract on the D axis
    # of both operands so no explicit K transpose is materialized.
    q = (q_ref[0] * inv_scale).astype(matmul_dtype)          # (TQ, D)
    k = k_ref[0].astype(matmul_dtype)                        # (S,  D)
    scores = lax.dot_general(q, k, (((1,), (1,)), ((), ())),
                             preferred_element_type=jnp.float32)   # (TQ, S) f32

    # Single delta = j - i iota gives both the direction test and the distance term.
    q0 = pl.program_id(1) * tq
    delta = (lax.broadcasted_iota(jnp.int32, (tq, S), 1)
             - lax.broadcasted_iota(jnp.int32, (tq, S), 0)) - q0
    dir_ok = (delta < 0) if direction == 'fw' else (delta > 0)
    # On valid (dir_ok) entries alpha_signed*delta == -alpha*|i-j|; masked entries are
    # zeroed by `mask` below, so their value is irrelevant.
    att = scores + alpha_signed * delta.astype(jnp.float32)

    # Combined 0/1 mask = rep_col * rep_row * dir_mask: one mul + one select.
    mask = jnp.where(dir_ok, rm_col_ref[0] * rm_row_ref[0], 0.0)   # (TQ, S)

    # Masked softmax along keys — exact PyTorch masked_softmax semantics.
    masked_vec = att * mask
    max_vec = jnp.max(masked_vec, axis=-1, keepdims=True)
    masked_exps = jnp.exp(masked_vec - max_vec) * mask
    masked_sums = jnp.sum(masked_exps, axis=-1, keepdims=True)
    masked_sums = masked_sums + (masked_sums == 0).astype(jnp.float32)
    # Exact per-row divide on the (TQ, 1) vector (approx reciprocal was not accurate
    # enough for the returned attention matrix), broadcast-multiplied across keys.
    attn = masked_exps * (1.0 / (masked_sums + 1e-20))

    out = jnp.dot(attn.astype(matmul_dtype), v_ref[0].astype(matmul_dtype),
                  preferred_element_type=jnp.float32)

    out_ref[0] = out.astype(out_ref.dtype)
    attn_ref[0] = attn.astype(attn_ref.dtype)


def masked_attention(q, k, v, rep_mask, *, direction='fw', alpha=1.5,
                     matmul_dtype=jnp.bfloat16, attn_dtype=jnp.float32):
    """Returns (out, attention) like the PyTorch module.

    matmul_dtype: MXU input dtype (bf16 default, f32 accumulation); jnp.float32 for exact
                  f32 numerics.
    attn_dtype:   dtype of the returned attention matrix (the dominant HBM stream);
                  jnp.bfloat16 halves that writeback if the caller tolerates it.
    """
    B, S, D = q.shape
    inv_scale = 1.0 / math.sqrt(D)
    alpha_signed = float(alpha) if direction == 'fw' else -float(alpha)
    attn_bytes = jnp.dtype(attn_dtype).itemsize

    tq = _choose_tq(B, S, D, attn_bytes)
    n_q_tiles = pl.cdiv(S, tq)

    # Two views of the same token-validity mask (tiny next to the S^2 attn stream).
    rm_col = rep_mask.reshape(B, S, 1).astype(jnp.float32)
    rm_row = rep_mask.reshape(B, 1, S).astype(jnp.float32)

    kernel = functools.partial(masked_attention_kernel, inv_scale=inv_scale,
                               alpha_signed=alpha_signed, direction=direction,
                               tq=tq, matmul_dtype=matmul_dtype)

    # Always pass an explicit scoped-VMEM limit derived from the corrected estimate
    # (v5e's 16 MiB default is too small for mid-size S); clip under v7x's 64 MiB physical.
    est = _vmem_bytes_per_step(S, D, tq, attn_bytes)
    vmem_limit = int(min(max(2 * est + (4 << 20), 32 << 20), 56 << 20))

    out, attn = pl.pallas_call(
        kernel,
        out_shape=(jax.ShapeDtypeStruct((B, S, D), jnp.float32),
                   jax.ShapeDtypeStruct((B, S, S), attn_dtype)),
        grid=(B, n_q_tiles),
        in_specs=[
            pl.BlockSpec((1, tq, D), lambda b, qi: (b, qi, 0)),   # q tile
            pl.BlockSpec((1, S, D), lambda b, qi: (b, 0, 0)),     # full K (resident across q tiles)
            pl.BlockSpec((1, S, D), lambda b, qi: (b, 0, 0)),     # full V (resident across q tiles)
            pl.BlockSpec((1, tq, 1), lambda b, qi: (b, qi, 0)),   # rep mask, query rows
            pl.BlockSpec((1, 1, S), lambda b, qi: (b, 0, 0)),     # rep mask, key row
        ],
        out_specs=(
            pl.BlockSpec((1, tq, D), lambda b, qi: (b, qi, 0)),
            pl.BlockSpec((1, tq, S), lambda b, qi: (b, qi, 0)),
        ),
        compiler_params=pltpu.CompilerParams(
            dimension_semantics=("parallel", "parallel"),
            vmem_limit_bytes=vmem_limit),
    )(q, k, v, rm_col, rm_row)
    return out, attn


def _reference(q, k, v, rep_mask, direction='fw', alpha=1.5):
    """Pure-JAX reference mirroring the PyTorch forward (full f32)."""
    B, S, D = q.shape
    scale = math.sqrt(D)
    scores = jnp.einsum('bsd,btd->bst', q, k, precision=lax.Precision.HIGHEST) / scale
    i = np.arange(S)[:, None]
    j = np.arange(S)[None, :]
    if direction == 'fw':
        dir_mask = (j < i).astype(np.float32)
    else:
        dir_mask = (j > i).astype(np.float32)
    dis_mask = -np.abs(i - j).astype(np.float32)
    rep = rep_mask.reshape(B, S, 1) * rep_mask.reshape(B, 1, S)
    mask = rep * dir_mask[None]
    att = scores + alpha * dis_mask[None]
    masked_vec = att * mask
    max_vec = jnp.max(masked_vec, axis=2, keepdims=True)
    exps = jnp.exp(masked_vec - max_vec)
    masked_exps = exps * mask
    sums = jnp.sum(masked_exps, axis=2, keepdims=True)
    sums = sums + (sums == 0).astype(jnp.float32)
    attn = masked_exps / (sums + 1e-20)
    out = jnp.einsum('bst,btd->bsd', attn, v, precision=lax.Precision.HIGHEST)
    return out, attn


if __name__ == "__main__":
    B, S, D = 2, 8, 32          # batch, seq_len, model_dim
    direction = 'fw'
    alpha = 1.5

    key = jax.random.PRNGKey(0)
    kq, kk, kv, km = jax.random.split(key, 4)
    q = jax.random.normal(kq, (B, S, D), dtype=jnp.float32)
    k = jax.random.normal(kk, (B, S, D), dtype=jnp.float32)
    v = jax.random.normal(kv, (B, S, D), dtype=jnp.float32)
    # 0/1 token validity mask (last two tokens of batch 1 masked out)
    rep_mask = jnp.ones((B, S, 1), dtype=jnp.float32)
    rep_mask = rep_mask.at[1, S - 2:, 0].set(0.0)

    out_ref, attn_ref = _reference(q, k, v, rep_mask, direction=direction, alpha=alpha)

    # Default fast path: bf16 MXU inputs, f32 accumulation / outputs.
    out, attn = masked_attention(q, k, v, rep_mask, direction=direction, alpha=alpha)
    out = jax.block_until_ready(out)
    attn = jax.block_until_ready(attn)
    # Tolerance sized for the bf16 rounding of the MXU inputs (everything else is f32).
    np.testing.assert_allclose(np.asarray(out), np.asarray(out_ref), atol=5e-2, rtol=5e-2)
    np.testing.assert_allclose(np.asarray(attn), np.asarray(attn_ref), atol=5e-2, rtol=5e-2)

    # Exact-precision path (f32 matmuls) — tighter check of the kernel math itself.
    out32, attn32 = masked_attention(q, k, v, rep_mask, direction=direction, alpha=alpha,
                                     matmul_dtype=jnp.float32)
    out32 = jax.block_until_ready(out32)
    attn32 = jax.block_until_ready(attn32)
    np.testing.assert_allclose(np.asarray(out32), np.asarray(out_ref), atol=2e-2, rtol=2e-2)
    np.testing.assert_allclose(np.asarray(attn32), np.asarray(attn_ref), atol=2e-2, rtol=2e-2)

    print("KERNEL_OK")
</pallas_src>

<mosaic_0001>
module attributes {stable_mosaic.version = 11 : i64} {
  func.func @masked_attention_kernel(%arg0: i32, %arg1: i32, %arg2: memref<1x8x32xf32, #tpu.memory_space<vmem>>, %arg3: memref<1x8x32xf32, #tpu.memory_space<vmem>>, %arg4: memref<1x8x32xf32, #tpu.memory_space<vmem>>, %arg5: memref<1x8x1xf32, #tpu.memory_space<vmem>>, %arg6: memref<1x1x8xf32, #tpu.memory_space<vmem>>, %arg7: memref<1x8x32xf32, #tpu.memory_space<vmem>>, %arg8: memref<1x8x8xf32, #tpu.memory_space<vmem>>) attributes {dimension_semantics = [#tpu.dimension_semantics<parallel>, #tpu.dimension_semantics<parallel>], iteration_bounds = array<i64: 2, 1>, scalar_prefetch = 0 : i64, scratch_operands = 0 : i64, tpu.core_type = #tpu.core_type<tc>, window_params = [{transform_indices = @transform_0, window_bounds = array<i64: 1, 8, 32>}, {transform_indices = @transform_1, window_bounds = array<i64: 1, 8, 32>}, {transform_indices = @transform_2, window_bounds = array<i64: 1, 8, 32>}, {transform_indices = @transform_3, window_bounds = array<i64: 1, 8, 1>}, {transform_indices = @transform_4, window_bounds = array<i64: 1, 1, 8>}, {transform_indices = @transform_5, window_bounds = array<i64: 1, 8, 32>}, {transform_indices = @transform_6, window_bounds = array<i64: 1, 8, 8>}]} {
    %c0 = arith.constant 0 : index
    %c0_0 = arith.constant 0 : index
    %c0_1 = arith.constant 0 : index
    %0 = vector.load %arg2[%c0, %c0_0, %c0_1] : memref<1x8x32xf32, #tpu.memory_space<vmem>>, vector<1x8x32xf32>
    %1 = vector.shape_cast %0 : vector<1x8x32xf32> to vector<8x32xf32>
    %cst = arith.constant 0.176776692 : f32
    %2 = vector.broadcast %cst : f32 to vector<8x32xf32>
    %3 = arith.mulf %1, %2 : vector<8x32xf32>
    %4 = arith.truncf %3 : vector<8x32xf32> to vector<8x32xbf16>
    %c0_2 = arith.constant 0 : index
    %c0_3 = arith.constant 0 : index
    %c0_4 = arith.constant 0 : index
    %5 = vector.load %arg3[%c0_2, %c0_3, %c0_4] : memref<1x8x32xf32, #tpu.memory_space<vmem>>, vector<1x8x32xf32>
    %6 = vector.shape_cast %5 : vector<1x8x32xf32> to vector<8x32xf32>
    %7 = arith.truncf %6 : vector<8x32xf32> to vector<8x32xbf16>
    %cst_5 = arith.constant dense<0.000000e+00> : vector<8x8xf32>
    %8 = tpu.matmul %4, %7, %cst_5 {dimension_numbers = #tpu.dot_dimension_numbers<[1], [1], [0], [0], [0, 0, 1, 0], [], []>} : vector<8x32xbf16>, vector<8x32xbf16>, vector<8x8xf32> -> vector<8x8xf32>
    %c8_i32 = arith.constant 8 : i32
    %9 = arith.muli %arg1, %c8_i32 : i32
    %10 = tpu.iota {dimensions = array<i32: 1>} : vector<8x8xi32>
    %11 = tpu.iota {dimensions = array<i32: 0>} : vector<8x8xi32>
    %12 = arith.subi %10, %11 : vector<8x8xi32>
    %13 = vector.broadcast %9 : i32 to vector<8x8xi32>
    %14 = arith.subi %12, %13 : vector<8x8xi32>
    %c0_i32 = arith.constant 0 : i32
    %15 = vector.broadcast %c0_i32 : i32 to vector<8x8xi32>
    %16 = arith.cmpi slt, %14, %15 : vector<8x8xi32>
    %17 = arith.sitofp %14 : vector<8x8xi32> to vector<8x8xf32>
    %cst_6 = arith.constant 1.500000e+00 : f32
    %18 = vector.broadcast %cst_6 : f32 to vector<8x8xf32>
    %19 = arith.mulf %18, %17 : vector<8x8xf32>
    %20 = arith.addf %8, %19 : vector<8x8xf32>
    %c0_7 = arith.constant 0 : index
    %c0_8 = arith.constant 0 : index
    %c0_9 = arith.constant 0 : index
    %21 = vector.load %arg5[%c0_7, %c0_8, %c0_9] : memref<1x8x1xf32, #tpu.memory_space<vmem>>, vector<1x8x1xf32>
    %22 = vector.shape_cast %21 : vector<1x8x1xf32> to vector<8x1xf32>
    %c0_10 = arith.constant 0 : index
    %c0_11 = arith.constant 0 : index
    %c0_12 = arith.constant 0 : index
    %23 = vector.load %arg6[%c0_10, %c0_11, %c0_12] : memref<1x1x8xf32, #tpu.memory_space<vmem>>, vector<1x1x8xf32>
    %24 = vector.shape_cast %23 : vector<1x1x8xf32> to vector<1x8xf32>
    %25 = vector.broadcast %22 : vector<8x1xf32> to vector<8x8xf32>
    %26 = vector.broadcast %24 : vector<1x8xf32> to vector<8x8xf32>
    %27 = arith.mulf %25, %26 : vector<8x8xf32>
    %cst_13 = arith.constant 0.000000e+00 : f32
    %28 = vector.broadcast %cst_13 : f32 to vector<8x8xf32>
    %29 = arith.select %16, %27, %28 : vector<8x8xi1>, vector<8x8xf32>
    %30 = arith.mulf %20, %29 : vector<8x8xf32>
    %cst_14 = arith.constant dense<0xFF800000> : vector<8xf32>
    %31 = vector.multi_reduction <maximumf>, %30, %cst_14 [1] : vector<8x8xf32> to vector<8xf32>
    %32 = vector.shape_cast %31 : vector<8xf32> to vector<8x1xf32>
    %33 = vector.broadcast %32 : vector<8x1xf32> to vector<8x8xf32>
    %34 = arith.subf %30, %33 : vector<8x8xf32>
    %35 = math.exp %34 : vector<8x8xf32>
    %36 = arith.mulf %35, %29 : vector<8x8xf32>
    %cst_15 = arith.constant dense<0.000000e+00> : vector<8xf32>
    %37 = vector.multi_reduction <add>, %36, %cst_15 [1] : vector<8x8xf32> to vector<8xf32>
    %38 = vector.shape_cast %37 : vector<8xf32> to vector<8x1xf32>
    %cst_16 = arith.constant 0.000000e+00 : f32
    %39 = vector.broadcast %cst_16 : f32 to vector<8x1xf32>
    %40 = arith.cmpf oeq, %38, %39 : vector<8x1xf32>
    %41 = arith.extui %40 : vector<8x1xi1> to vector<8x1xi32>
    %42 = arith.sitofp %41 : vector<8x1xi32> to vector<8x1xf32>
    %43 = arith.addf %38, %42 : vector<8x1xf32>
    %cst_17 = arith.constant 9.99999968E-21 : f32
    %44 = vector.broadcast %cst_17 : f32 to vector<8x1xf32>
    %45 = arith.addf %43, %44 : vector<8x1xf32>
    %cst_18 = arith.constant 1.000000e+00 : f32
    %46 = vector.broadcast %cst_18 : f32 to vector<8x1xf32>
    %47 = arith.divf %46, %45 : vector<8x1xf32>
    %48 = vector.broadcast %47 : vector<8x1xf32> to vector<8x8xf32>
    %49 = arith.mulf %36, %48 : vector<8x8xf32>
    %50 = arith.truncf %49 : vector<8x8xf32> to vector<8x8xbf16>
    %c0_19 = arith.constant 0 : index
    %c0_20 = arith.constant 0 : index
    %c0_21 = arith.constant 0 : index
    %51 = vector.load %arg4[%c0_19, %c0_20, %c0_21] : memref<1x8x32xf32, #tpu.memory_space<vmem>>, vector<1x8x32xf32>
    %52 = vector.shape_cast %51 : vector<1x8x32xf32> to vector<8x32xf32>
    %53 = arith.truncf %52 : vector<8x32xf32> to vector<8x32xbf16>
    %cst_22 = arith.constant dense<0.000000e+00> : vector<8x32xf32>
    %54 = tpu.matmul %50, %53, %cst_22 {dimension_numbers = #tpu.dot_dimension_numbers<[1], [0], [0], [1], [0, 0, 1, 1], [], []>} : vector<8x8xbf16>, vector<8x32xbf16>, vector<8x32xf32> -> vector<8x32xf32>
    %c0_23 = arith.constant 0 : index
    %c0_24 = arith.constant 0 : index
    %c0_25 = arith.constant 0 : index
    %55 = vector.load %arg7[%c0_23, %c0_24, %c0_25] : memref<1x8x32xf32, #tpu.memory_space<vmem>>, vector<1x8x32xf32>
    %56 = vector.shape_cast %55 : vector<1x8x32xf32> to vector<8x32xf32>
    %57 = vector.shape_cast %54 : vector<8x32xf32> to vector<1x8x32xf32>
    tpu.vector_store %arg7[%c0_23, %c0_24, %c0_25], %57 {strides = array<i32>} : memref<1x8x32xf32, #tpu.memory_space<vmem>>, vector<1x8x32xf32>,
    %c0_26 = arith.constant 0 : index
    %c0_27 = arith.constant 0 : index
    %c0_28 = arith.constant 0 : index
    %58 = vector.load %arg8[%c0_26, %c0_27, %c0_28] : memref<1x8x8xf32, #tpu.memory_space<vmem>>, vector<1x8x8xf32>
    %59 = vector.shape_cast %58 : vector<1x8x8xf32> to vector<8x8xf32>
    %60 = vector.shape_cast %49 : vector<8x8xf32> to vector<1x8x8xf32>
    tpu.vector_store %arg8[%c0_26, %c0_27, %c0_28], %60 {strides = array<i32>} : memref<1x8x8xf32, #tpu.memory_space<vmem>>, vector<1x8x8xf32>,
    return
  }
  func.func @transform_0(%arg0: i32, %arg1: i32) -> (i32, i32, i32) {
    %c0_i32 = arith.constant 0 : i32
    %c0_i32_0 = arith.constant 0 : i32
    return %arg0, %arg1, %c0_i32 : i32, i32, i32
  }
  func.func @transform_1(%arg0: i32, %arg1: i32) -> (i32, i32, i32) {
    %c0_i32 = arith.constant 0 : i32
    %c0_i32_0 = arith.constant 0 : i32
    %c0_i32_1 = arith.constant 0 : i32
    return %arg0, %c0_i32, %c0_i32_0 : i32, i32, i32
  }
  func.func @transform_2(%arg0: i32, %arg1: i32) -> (i32, i32, i32) {
    %c0_i32 = arith.constant 0 : i32
    %c0_i32_0 = arith.constant 0 : i32
    %c0_i32_1 = arith.constant 0 : i32
    return %arg0, %c0_i32, %c0_i32_0 : i32, i32, i32
  }
  func.func @transform_3(%arg0: i32, %arg1: i32) -> (i32, i32, i32) {
    %c0_i32 = arith.constant 0 : i32
    %c0_i32_0 = arith.constant 0 : i32
    return %arg0, %arg1, %c0_i32 : i32, i32, i32
  }
  func.func @transform_4(%arg0: i32, %arg1: i32) -> (i32, i32, i32) {
    %c0_i32 = arith.constant 0 : i32
    %c0_i32_0 = arith.constant 0 : i32
    %c0_i32_1 = arith.constant 0 : i32
    return %arg0, %c0_i32, %c0_i32_0 : i32, i32, i32
  }
  func.func @transform_5(%arg0: i32, %arg1: i32) -> (i32, i32, i32) {
    %c0_i32 = arith.constant 0 : i32
    %c0_i32_0 = arith.constant 0 : i32
    return %arg0, %arg1, %c0_i32 : i32, i32, i32
  }
  func.func @transform_6(%arg0: i32, %arg1: i32) -> (i32, i32, i32) {
    %c0_i32 = arith.constant 0 : i32
    %c0_i32_0 = arith.constant 0 : i32
    return %arg0, %arg1, %c0_i32 : i32, i32, i32
  }
}

</mosaic_0001>

<bundles_post_ra>
// kernel: tpu_custom_call.1
= control target key start
LH: loop header
LB: loop body
LE: loop exit
PB: predicated region body
PF: predicated region fallthrough
CT: control target
= control target key end

     0   :  { %s1376_s0 = inlined_call_operand.vmem [shape: f32[2,8,32], index: 0, kind: input, shape index: {}]   ;;  %s1377_s1 = inlined_call_operand.hbm [shape: f32[2,8,32], index: 1, kind: input, shape index: {}]   ;;  %s1378_s2 = inlined_call_operand.hbm [shape: f32[2,8,32], index: 2, kind: input, shape index: {}]   ;;  %s1379_s3 = inlined_call_operand.vmem [shape: f32[2,8,1], index: 3, kind: input, shape index: {}]   ;;  %s1380_s4 = inlined_call_operand.vmem [shape: f32[2,1,8], index: 4, kind: input, shape index: {}]   ;;  %s1381_s5 = inlined_call_operand.hbm [shape: f32[2,8,32], index: 5, kind: output, shape index: {0}]   ;;  %s1382_s6 = inlined_call_operand.hbm [shape: f32[2,8,8], index: 6, kind: output, shape index: {1}]  }
   0x1   :  { %1386 = sst [smem:[#allocation14_spill]] %s1377_s1 }
   0x2   :  { %12 = vsyncpa [#allocation3], 0 }
   0x3   :  { %14 = vsyncpa [#allocation3 + $0x1], 0 }
   0x4   :  { %15 = vsyncpa [#allocation6], 0 }
   0x5   :  { %17 = vsyncpa [#allocation6 + $0x1], 0 }
   0x6   :  { %18 = vsyncpa [#allocation4], 0 }
   0x7   :  { %20 = vsyncpa [#allocation4 + $0x1], 0 }
   0x8   :  { %21 = vsyncpa [#allocation9], 0 }
   0x9   :  { %23 = vsyncpa [#allocation9 + $0x1], 0  ;;  %s1103_s21 = smov 0   ;;  %s1105_s22 = smov 0  }
   0xa   :  { %s1107_s23 = smov 0   ;;  %s1109_s24 = smov 0  }
   0xb   :  { %s1111_s25 = smov 0   ;;  %s1113_s26 = smov 0  }
   0xc LB: > { %s760_s27 = sadd.s32 4294967295, %s1059_s26   ;;  %s761_s28 = sadd.s32 4294967294, %s1059_s26   ;;  %s1059_s26 = sphi %s1113_s26, %s29_s26   ;;  %s1055_s25 = sphi %s1111_s25, %s1406_s25   ;;  %s1051_s24 = sphi %s1109_s24, %s1405_s24   ;;  %s1047_s23 = sphi %s1107_s23, %s1404_s23   ;;  %s1043_s22 = sphi %s1105_s22, %s1403_s22   ;;  %s1039_s21 = sphi %s1103_s21, %s1402_s21  }
   0xd   : > { %s41_s29 = sadd.s32 1, %s1055_s25  ;;  %s76_s30 = sadd.s32 1, %s1047_s23 }
   0xe   : > { %p43_p0 = scmp.ge.s32.totalorder %s41_s29, 2  ;;  %p83_p1 = scmp.ne.s32.totalorder %s1047_s23, %s1043_s22 }
   0xf   : > { %p84_p2 = scmp.eq.s32.totalorder %s1059_s26, 0  ;;  %p89_p3 = scmp.ne.s32.totalorder %s1043_s22, %s1039_s21 }
  0x10   : > { %s1408_s29 = smov (%p43_p0, %s41_s29), 0  ;;  %p90_p5 = scmp.eq.s32.totalorder %s760_s27, 0 }
  0x11   : > { %p1144_p4 = por %p84_p2, %p83_p1  ;;  %s73_s8 = ssub.s32 %s1055_s25, %s1408_s29 }
  0x12   : > { %p195_p6 = scmp.eq.s32.totalorder %s760_s27, 1  ;;  %p74_p7 = scmp.eq.s32.totalorder %s73_s8, 0 }
  0x13   : > { %p1150_p8 = por %p90_p5, %p89_p3  ;;  %p201_p10 = scmp.eq.s32.totalorder %s761_s28, 1 }
  0x14   : > { %p1154_p9 = por %p195_p6, %p83_p1  ;;  %p823_p13 = scmp.lt.s32.totalorder %s1059_s26, 2 }
  0x15   : > { %s1388_s9 = scalar_select %p1150_p8, 1, 0 }
  0x16   : > { %s1389_s10 = scalar_select %p1154_p9, 1, 0 }
  0x17   : > { %s1159_s11 = scalar_select %p74_p7, %s1047_s23, %s76_s30  }
  0x18   : > { %p1161_p11 = por %p201_p10, %p89_p3  ;;  %s1168_s13 = sand.u32 1, %s1047_s23  }
  0x19   : > { %s1383_s14 = sshll.u32 %s1168_s13, 3  ;;  %s765_s15 = sshll.u32 %s1055_s25, 7 }
  0x1a   : > { %s1390_s12 = scalar_select %p1161_p11, 1, 0 }
  0x1b   : > { %s1391_s1 = sld [smem:[#allocation14_spill]]  ;;  %s263_s19 = scalar_lea.vmem [#allocation2], %s1383_s14 }
  0x1c   : > { %s270_s20 = sshll.u32 %s263_s19, 4  ;;  %p1185_p0 = pnand %p823_p13, %p1144_p4  ;;  %s1181_s20 = int_to_ptr.vmem [resolvable:$true] %s270_s20 }
  0x1d   : > { %s260_s28 = scalar_lea.sflag [#allocation3], %s1168_s13 }
  0x1e   : > { %p883_p5 = pneg %p1185_p0 }
  0x21   : > { %s1177_s18 = scalar_lea.hbm %s1391_s1, %s765_s15  ;;  %s886_s7 = scalar_lea.hbm %s1391_s1, 256 }
  0x22   : > { %s881_s30 = scalar_lea.hbm %s1177_s18, 128  ;;  %p887_p4 = scmp.lt.u32.totalorder %s1177_s18, %s1391_s1 }
  0x23   : > { %p882_p3 = scmp.ne.s32.totalorder %s1177_s18, %s881_s30  ;;  %p888_p10 = scmp.lt.u32.totalorder %s886_s7, %s881_s30 }
  0x24   : > { %p890_p12 = scmp.lt.u32.totalorder %s881_s30, %s1177_s18 }
  0x25   : > { %p884_p6 = pnand %p883_p5, %p882_p3  ;;  %p889_p13 = por %p888_p10, %p887_p4 }
  0x27   : > { %p885_p7 = pneg %p884_p6  ;;  %p891_p1 = por %p890_p12, %p889_p13 }
  0x29   : > { %p892_p2 = pnand %p891_p1, %p885_p7 }
  0x2b   : > { %895 = shalt.err (!%p892_p2)
}
  0x2c   : > { %s896_s14 = scalar_lea.vmem %s1181_s20, 128  ;;  %s1061_s8 = smov [#allocation2]  }
  0x2d   : > { %p897_p3 = scmp.ne.s32.totalorder %s1181_s20, %s896_s14  ;;  %s901_s16 = sshll.u32 %s1061_s8, 4  ;;  %s902_s16 = int_to_ptr.vmem [resolvable:$false] %s901_s16 }
  0x2e   : > { %s903_s17 = scalar_lea.vmem %s902_s16, 256  ;;  %p904_p9 = scmp.lt.s32.totalorder %s1181_s20, %s902_s16 }
  0x2f   : > { %p899_p6 = pnand %p897_p3, %p883_p5  ;;  %p905_p4 = scmp.lt.s32.totalorder %s903_s17, %s896_s14 }
  0x31   : > { %p900_p11 = pneg %p899_p6  ;;  %p906_p10 = por %p905_p4, %p904_p9 }
  0x33   : > { %p907_p12 = pnand %p906_p10, %p900_p11 }
  0x35   : > { %910 = shalt.err (!%p907_p12)
}
  0x36   : > { %812 = dma.hbm_to_vmem [thread:$0]  (!%p1185_p0), %s1177_s18, 128, %s1181_s20, %s260_s28  }
  0x37   : > { %p1393_p1 = scmp.lt.s32.totalorder %s1059_s26, 3  ;;  %p1394_p2 = scmp.ge.s32.totalorder %s1059_s26, 1 }
  0x38   : > { %s1230_s19 = scalar_lea.hbm %s1378_s2, %s765_s15  ;;  %s1396_s8 = sshll.u32 %s1168_s13, 3 }
  0x39   : > { %p1221_p7 = pnand %p1394_p2, %p1393_p1  ;;  %s281_s16 = scalar_lea.vmem [#allocation5], %s1396_s8 }
  0x3a   : > { %s288_s17 = sshll.u32 %s281_s16, 4  ;;  %s278_s18 = scalar_lea.sflag [#allocation6], %s1168_s13  ;;  %s289_s17 = int_to_ptr.vmem [resolvable:$true] %s288_s17 }
  0x3b   : > { %s1395_s30 = scalar_select %p1221_p7, 1, 0 }
  0x3c   : > { %s911_s20 = scalar_lea.hbm %s1230_s19, 128  ;;  %s916_s15 = scalar_lea.hbm %s1378_s2, 256 }
  0x3d   : > { %p912_p9 = scmp.ne.s32.totalorder %s1230_s19, %s911_s20  ;;  %p917_p3 = scmp.lt.u32.totalorder %s1230_s19, %s1378_s2 }
  0x3e   : > { %p918_p6 = scmp.lt.u32.totalorder %s916_s15, %s911_s20  ;;  %p920_p10 = scmp.lt.u32.totalorder %s911_s20, %s1230_s19 }
  0x3f   : > { %p914_p11 = pnand %p912_p9, %p883_p5 }
  0x40   : > { %p919_p4 = por %p918_p6, %p917_p3 }
  0x41   : > { %p915_p13 = pneg %p914_p11 }
  0x42   : > { %p921_p12 = por %p920_p10, %p919_p4 }
  0x44   : > { %p922_p1 = pnand %p921_p12, %p915_p13 }
  0x46   : > { %925 = shalt.err (!%p922_p1)
}
  0x47   : > { %s926_s13 = scalar_lea.vmem %s289_s17, 128  ;;  %s1062_s8 = smov [#allocation5]  }
  0x48   : > { %p927_p2 = scmp.ne.s32.totalorder %s289_s17, %s926_s13  ;;  %s931_s1 = sshll.u32 %s1062_s8, 4  ;;  %s932_s1 = int_to_ptr.vmem [resolvable:$false] %s931_s1 }
  0x49   : > { %s933_s16 = scalar_lea.vmem %s932_s1, 256  ;;  %p934_p8 = scmp.lt.s32.totalorder %s289_s17, %s932_s1 }
  0x4a   : > { %p929_p9 = pnand %p927_p2, %p883_p5  ;;  %p935_p7 = scmp.lt.s32.totalorder %s933_s16, %s926_s13 }
  0x4c   : > { %p930_p11 = pneg %p929_p9  ;;  %p936_p3 = por %p935_p7, %p934_p8 }
  0x4e   : > { %p937_p6 = pnand %p936_p3, %p930_p11 }
  0x50   : > { %940 = shalt.err (!%p937_p6)
}
  0x51   : > { %815 = dma.hbm_to_vmem [thread:$0]  (!%p1185_p0), %s1230_s19, 128, %s289_s17, %s278_s18  }
  0x52   : > { %p1397_p13 = scmp.ne.s32.totalorder %s1395_s30, 0 }
  0x53   : > { %s1257_s20 = sand.u32 (!%p1397_p13), 1, %s1043_s22   ;;  %p1398_p8 = scmp.ne.s32.totalorder (!%p1397_p13), %s1388_s9, 0 }
  0x54   : > { %313 = sbr.rel (%p1397_p13) target bundleno = 872 (0x368), region = 40  ;;  %s1260_s28 = sshll.u32 (!%p1397_p13), %s1257_s20, 3 }
  0x55   : > { %s316_s15 = scalar_lea.sflag (!%p1397_p13), [#allocation3], %s1257_s20  ;;  %s319_s14 = scalar_lea.vmem (!%p1397_p13), [#allocation2], %s1260_s28 }
  0x5b   : > { %1022 = dma.done.wait (%p1398_p8), %s316_s15, 128  }
  0x5c   : > { %1024 = vsyncadd (%p1398_p8), %s316_s15, 4294967168  ;;  %s325_s27 = scalar_lea.sflag [#allocation6], %s1257_s20  ;;  %s328_s30 = scalar_lea.vmem [#allocation5], %s1260_s28 }
  0x5d   : > { %1026 = dma.done.wait (%p1398_p8), %s325_s27, 128  }
  0x5e   : > { %1028 = vsyncadd (%p1398_p8), %s325_s27, 4294967168  ;;  %p384_p0 = scmp.lt.s32.totalorder %s1051_s24, 1  ;;  %v1063_v0 = vmov 0.0   ;;  %vm1064_vm0 = vmmov 0   ;;  %v1065_v1 = vmov 0   ;;  %v405_v2 = vld [vmem:[%s319_s14] sm:$0xff]  ;;  %v408_v9 = vlaneseq }
  0x5f   : > { %789 = vmatprep.subr.bf16.mxu0 %v1063_v0  ;;  %791 = vmatprep.mubr.msk.bf16.mxu0 %vm1064_vm0, %v1063_v0  ;;  %vm418_vm1 = vcmask 261120   ;;  %v406_v5 = vpack.c.bf16 %v405_v2, %v405_v2  ;;  %vm481_vm3 = vcmask 64512   ;;  %v501_v32 = vld [vmem:[%s328_s30] sm:$0xff]  ;;  %vm506_vm4 = vcmask 1043456   ;;  %s383_s27 = scalar_lea.vmem [#allocation8], %s1260_s28  ;;  %s781_s30 = sshll.u32 %s1051_s24, 7 }
  0x60   : > { %s385_s19 = scalar_select %p384_p0, %s1051_s24, 1  ;;  %876 = vset.pattern.permute.xlu0 %v1065_v1  ;;  %795 = vmatprep.subr.bf16.mxu1 %v1063_v0  ;;  %v409_v10 = vand.u32 127, %v408_v9  ;;  %v411_v11 = vshrl.u32 %v408_v9, 7  ;;  %v502_v33 = vpack.c.bf16 %v501_v32, %v501_v32 }
  0x61   : > { %797 = vmatprep.mubr.msk.bf16.mxu1 %vm1064_vm0, %v1063_v0  ;;  %v423_v6 = vsel %vm418_vm1, %v406_v5, 0  ;;  %s1300_s18 = scalar_lea.hbm %s1382_s6, %s781_s30  ;;  %s586_s7 = sshll.u32 %s383_s27, 4  ;;  %s587_s7 = int_to_ptr.vmem [resolvable:$true] %s586_s7 }
  0x62   : > { %s773_s17 = sshll.u32 %s385_s19, 3  ;;  %790 = vmatpush3.bf16.xpose.msra.mxu0 %v423_v6  ;;  %v412_v12 = vsub.s32 %v409_v10, %v411_v11  ;;  %s400_s14 = scalar_lea.vmem %s1380_s4, %s385_s19  ;;  %v508_v34 = vsel %vm506_vm4, %v502_v33, 0 }
  0x63   : > { %s390_s13 = scalar_lea.vmem %s1376_s0, %s773_s17  ;;  %s397_s1 = scalar_lea.vmem %s1379_s3, %s773_s17  ;;  %v776_v13 = vld [vmem:[%s400_s14] ss:$0 sm:$0xff]  ;;  %796 = vmatpush3.bf16.msra.mxu1 %v508_v34 }
  0x64   : > { %v402_v3 = vld [vmem:[%s390_s13] sm:$0xff]  ;;  %v416_v15 = vcvt.s32.f32 %v412_v12  ;;  %vm415_vm2 = vcmp.lt.s32.totalorder %v412_v12, 0  ;;  %s558_s13 = scalar_lea.sflag [#allocation9], %s1257_s20  ;;  %s941_s8 = scalar_lea.vmem %s587_s7, 128 }
  0x65   : > { %v465_v4 = vld [vmem:[%s397_s1] sm:$0xff]  ;;  %v403_v7 = vmul.f32 0.17677669, %v402_v3  ;;  %p942_p5 = scmp.ne.s32.totalorder %s587_s7, %s941_s8  ;;  %p1399_p7 = scmp.ne.s32.totalorder %s1389_s10, 0 }
  0x66   : > { %469 = vperm.xlu0 %876, %v465_v4   ;;  %v417_v17 = vmul.f32 1.5, %v416_v15  ;;  %s1066_s9 = smov [#allocation8]  }
  0x67   : > { %v404_v8 = vpack.c.bf16 %v403_v7, %v403_v7  ;;  %p943_p4 = pnand %p942_p5, %p1399_p7  ;;  %s945_s1 = sshll.u32 %s1066_s9, 4  ;;  %s946_s1 = int_to_ptr.vmem [resolvable:$false] %s945_s1 }
  0x68   : > { %s947_s16 = scalar_lea.vmem %s946_s1, 256  ;;  %p948_p12 = scmp.lt.s32.totalorder %s587_s7, %s946_s1 }
  0x69   : > { %792 = vmatmul.mubr.msk.bf16.vlgmr.msra.gmra.mrb[0].mxu0 %vm418_vm1, %v404_v8  ;;  %p944_p10 = pneg %p943_p4  ;;  %p949_p1 = scmp.lt.s32.totalorder %s947_s16, %s941_s8 }
  0x6b   : > { %p950_p2 = por %p949_p1, %p948_p12 }
  0x6d   : > { %p951_p9 = pnand %p950_p2, %p944_p10 }
  0xe5   : > { %v470_v14 = vpop.permute.xlu0 %469 }
  0xe6   : > { %v478_v16 = vmul.f32 %v776_v13, %v470_v14 }
  0xe8   : > { %v479_v18 = vsel %vm415_vm2, %v478_v16, 0.0 }
 0x13c   : > { %v459_v19 = vpop.f32.mrb[0].mxu0 }
 0x13d   : > { %v460_v20 = vadd.f32 %v459_v19, %v417_v17  ;;  %v793_v21 = vpop.f32.mrb[1].mxu0 }
 0x13e   : > { %v462_v22 = vpop.f32.mrb[2].mxu0 }
 0x13f   : > { %v794_v23 = vpop.f32.mrb[3].mxu0  ;;  %v480_v24 = vmul.f32 %v479_v18, %v460_v20 }
 0x141   : > { %v482_v25 = vsel %vm481_vm3, %v480_v24, -inf }
 0x142   : > { %483 = vmax.xlane.f32.xlu0 %v482_v25 }
 0x1cf   : > { %v484_v26 = vpop.xlane.xlu0 %483 }
 0x1d0   : > { %v485_v27 = vsub.f32 %v480_v24, %v484_v26 }
 0x1d2   : > { %v486_v28 = vmul.f32 1.442695, %v485_v27 }
 0x1d4   : > { %877 = vpow2.f32 %v486_v28 }
 0x1de   : > { %v878_v29 = vpop.eup %877 }
 0x1df   : > { %v488_v30 = vmul.f32 %v878_v29, %v479_v18 }
 0x1e1   : > { %v489_v31 = vsel %vm481_vm3, %v488_v30, 0.0 }
 0x1e2   : > { %490 = vadd.xlane.f32.xlu1 %v489_v31 }
 0x26f   : > { %v491_v35 = vpop.xlane.xlu1 %490 }
 0x270   : > { %vm492_vm5 = vcmp.eq.f32.partialorder %v491_v35, 0.0 }
 0x271   : > { %v777_v36 = vsel %vm492_vm5, 1.0, %v1063_v0 }
 0x272   : > { %v495_v37 = vadd.f32 %v777_v36, %v491_v35 }
 0x274   : > { %v496_v38 = vadd.f32 1e-20, %v495_v37 }
 0x276   : > { %879 = vrcp.f32 %v496_v38 }
 0x280   : > { %v880_v39 = vpop.eup %879 }
 0x281   : > { %v499_v40 = vmul.f32 %v880_v39, %v488_v30 }
 0x283   : > { %v500_v41 = vpack.c.bf16 %v499_v40, %v499_v40  ;;  %551 = vst.msk [vmem:[%s383_s27] sm:$0xff] %vm481_vm3, %v499_v40 }
 0x285   : > { %798 = vmatmul.mubr.msk.bf16.vlgmr.msra.gmra.mrb[0].mxu1 %vm481_vm3, %v500_v41 }
 0x286   : > { %954 = shalt.err (!%p951_p9)
}
 0x287   : > { %s955_s15 = scalar_lea.hbm %s1300_s18, 128  ;;  %s959_s19 = scalar_lea.hbm %s1382_s6, 256 }
 0x288   : > { %p956_p11 = scmp.ne.s32.totalorder %s1300_s18, %s955_s15  ;;  %p960_p13 = scmp.lt.u32.totalorder %s1300_s18, %s1382_s6 }
 0x289   : > { %p961_p8 = scmp.lt.u32.totalorder %s959_s19, %s955_s15  ;;  %p963_p5 = scmp.lt.u32.totalorder %s955_s15, %s1300_s18 }
 0x28a   : > { %p957_p3 = pnand %p956_p11, %p1399_p7 }
 0x28b   : > { %p962_p0 = por %p961_p8, %p960_p13 }
 0x28c   : > { %p958_p6 = pneg %p957_p3 }
 0x28d   : > { %p964_p4 = por %p963_p5, %p962_p0 }
 0x28f   : > { %p965_p10 = pnand %p964_p4, %p958_p6 }
 0x291   : > { %968 = shalt.err (!%p965_p10)
}
 0x292   : > { %806 = dma.vmem_to_hbm [thread:$0]  (%p1399_p7), %s587_s7, 128, %s1300_s18, %s558_s13  }
 0x293   : > { %s376_s8 = scalar_lea.vmem [#allocation7], %s1260_s28  ;;  %s1326_s27 = scalar_lea.hbm %s1381_s5, %s781_s30 }
 0x294   : > { %s572_s1 = sshll.u32 %s376_s8, 4  ;;  %s553_s15 = scalar_lea.sflag [#allocation4], %s1257_s20  ;;  %s1328_s1 = int_to_ptr.vmem [resolvable:$true] %s572_s1 }
 0x295   : > { %s969_s18 = scalar_lea.vmem %s1328_s1, 128  ;;  %s1067_s24 = smov [#allocation7]  }
 0x296   : > { %p970_p12 = scmp.ne.s32.totalorder %s1328_s1, %s969_s18  ;;  %s973_s28 = sshll.u32 %s1067_s24, 4  ;;  %s974_s28 = int_to_ptr.vmem [resolvable:$false] %s973_s28 }
 0x297   : > { %s975_s30 = scalar_lea.vmem %s974_s28, 256  ;;  %p976_p9 = scmp.lt.s32.totalorder %s1328_s1, %s974_s28 }
 0x298   : > { %p971_p1 = pnand %p970_p12, %p1399_p7  ;;  %p977_p11 = scmp.lt.s32.totalorder %s975_s30, %s969_s18 }
 0x29a   : > { %p972_p2 = pneg %p971_p1  ;;  %p978_p3 = por %p977_p11, %p976_p9 }
 0x29c   : > { %p979_p6 = pnand %p978_p3, %p972_p2 }
 0x358   : > { %v544_v42 = vpop.f32.mrb[0].mxu1 }
 0x359   : > { %550 = vst.msk [vmem:[%s376_s8] sm:$0xff] %vm418_vm1, %v544_v42  ;;  %v799_v43 = vpop.f32.mrb[1].mxu1 }
 0x35a   : > { %v547_v44 = vpop.f32.mrb[2].mxu1 }
 0x35b   : > { %982 = shalt.err (!%p979_p6)
}
 0x35c   : > { %s983_s20 = scalar_lea.hbm %s1326_s27, 128  ;;  %s987_s19 = scalar_lea.hbm %s1381_s5, 256 }
 0x35d   : > { %p984_p13 = scmp.ne.s32.totalorder %s1326_s27, %s983_s20  ;;  %p988_p5 = scmp.lt.u32.totalorder %s1326_s27, %s1381_s5 }
 0x35e   : > { %p989_p4 = scmp.lt.u32.totalorder %s987_s19, %s983_s20  ;;  %p991_p12 = scmp.lt.u32.totalorder %s983_s20, %s1326_s27 }
 0x35f   : > { %p985_p8 = pnand %p984_p13, %p1399_p7 }
 0x360   : > { %p990_p10 = por %p989_p4, %p988_p5 }
 0x361   : > { %p986_p0 = pneg %p985_p8 }
 0x362   : > { %p992_p1 = por %p991_p12, %p990_p10 }
 0x364   : > { %p993_p2 = pnand %p992_p1, %p986_p0 }
 0x366   : > { %996 = shalt.err (!%p993_p2)
}
 0x367   : > { %805 = dma.vmem_to_hbm [thread:$0]  (%p1399_p7), %s1328_s1, 128, %s1326_s27, %s553_s15   ;;  %v800_v45 = vpop.f32.mrb[3].mxu1 }
 0x368 PF: > { %s598_s8 = sand.u32 1, %s1039_s21   ;;  %p1400_p9 = scmp.ne.s32.totalorder %s1390_s12, 0 }
 0x369   : > { %p1401_p11 = scmp.ge.s32.totalorder %s1059_s26, 2  ;;  %s599_s16 = scalar_lea.sflag [#allocation4], %s598_s8 }
 0x36b   : > { %p817_p3 = pnand %p1401_p11, %p1400_p9 }
 0x36d   : > { %1030 = dma.done.wait (!%p817_p3), %s599_s16, 128  }
 0x36e   : > { %1032 = vsyncadd (!%p817_p3), %s599_s16, 4294967168  ;;  %s608_s14 = scalar_lea.sflag [#allocation9], %s598_s8 }
 0x36f   : > { %1034 = dma.done.wait (!%p817_p3), %s608_s14, 128  }
 0x370   : > { %1036 = vsyncadd (!%p817_p3), %s608_s14, 4294967168  ;;  %s29_s26 = sadd.s32 1, %s1059_s26   ;;  %s1402_s21 = smov %s1043_s22 }
 0x371   : > { %p26_p6 = scmp.ge.s32.totalorder %s29_s26, 4   ;;  %s1403_s22 = smov %s1047_s23 }
 0x372   : > { %s1404_s23 = smov %s1159_s11  ;;  %s1405_s24 = smov %s1055_s25 }
 0x373   : > { %s1406_s25 = smov %s1408_s29  ;;  %28 = sbr.rel (!%p26_p6) target bundleno = 12 (0xc), region = 124 }
 0x37a   :  { %613 = vsyncpa [#allocation3], 1 }
 0x37b   :  { %615 = vsyncpa [#allocation3 + $0x1], 1 }
 0x37c   :  { %616 = vsyncpa [#allocation6], 1 }
 0x37d   :  { %618 = vsyncpa [#allocation6 + $0x1], 1 }
 0x37e   :  { %619 = vsyncpa [#allocation4], 1 }
 0x37f   :  { %621 = vsyncpa [#allocation4 + $0x1], 1 }
 0x380   :  { %622 = vsyncpa [#allocation9], 1 }
 0x381   :  { %624 = vsyncpa [#allocation9 + $0x1], 1 }

</bundles_post_ra>
